<compile_context>
chip_gen: v7x
topology: tpu7x:2x2x1
jax: 0.10.0
libtpu: 0.0.40
codegen_flags: <defaults>
</compile_context>

<pallas_src>
import functools

import jax
import jax.numpy as jnp
from jax.experimental import pallas as pl
from jax.experimental.pallas import tpu as pltpu

IN_FEATURES = 10
OUT_FEATURES = 3
LANE = 128      # lane padding for the in-kernel math (weight/bias only, not the output)
TB_MAX = 8192   # batch tile cap: ~9 MiB worst-case VMEM -> safe on v5e/v6e/v7x defaults


def _round_up(n, m):
    return ((n + m - 1) // m) * m


def linear_kernel(x_ref, wt_ref, b_ref, o_ref):
    # MXU matmul with f32 accumulation. The math stays lane-padded (weight/bias are
    # padded to 128 lanes, tiny + VMEM-resident), but only the real out_features
    # columns are stored, so the HBM writeback is the unpadded (tb, 3) block.
    y = (
        jnp.dot(x_ref[...], wt_ref[...], preferred_element_type=jnp.float32)
        + b_ref[...]
    )
    o_ref[...] = y[:, : o_ref.shape[-1]].astype(o_ref.dtype)


def prepare_params(weight, bias, param_dtype=jnp.float32):
    """One-time prep (call at init, reuse across forwards).

    weight: [out_f, in_f] (PyTorch nn.Linear layout)  ->  wt_padded: [in_f, 128]
    bias:   [out_f]                                   ->  b_padded:  [1, 128] (f32)
    Padded columns >= out_f are zero, so the stored result is exact.
    """
    out_f, in_f = weight.shape
    wt_padded = (
        jnp.zeros((in_f, LANE), param_dtype)
        .at[:, :out_f]
        .set(weight.T.astype(param_dtype))
    )
    b_padded = (
        jnp.zeros((1, LANE), jnp.float32).at[:, :out_f].set(bias.astype(jnp.float32))
    )
    return wt_padded, b_padded


@functools.partial(jax.jit, static_argnames=("out_features", "tb"))
def simple_model_forward_prepared(x, wt_padded, b_padded,
                                  out_features=OUT_FEATURES, tb=None):
    """y = x @ W^T + b with pre-prepared (transposed + lane-padded) params."""
    B, in_f = x.shape
    assert wt_padded.shape[0] == in_f

    # Never cast x in the wrapper (extra HBM pass); if the param dtype differs
    # from x's, cast the tiny weight instead. bf16 x -> bf16 MXU, f32 accumulate.
    if wt_padded.dtype != x.dtype:
        wt_padded = wt_padded.astype(x.dtype)

    if tb is None:
        tb = min(TB_MAX, _round_up(B, 8))
    else:
        tb = _round_up(tb, 8)
    grid = (pl.cdiv(B, tb),)  # ragged final block handled by Pallas masking

    return pl.pallas_call(
        linear_kernel,
        out_shape=jax.ShapeDtypeStruct((B, out_features), x.dtype),
        grid=grid,
        in_specs=[
            # x: streamed tile-by-tile over the batch (double-buffered pipeline).
            pl.BlockSpec((tb, in_f), lambda i: (i, 0)),
            # weight / bias: constant block index -> VMEM-resident, DMA'd once.
            pl.BlockSpec((in_f, LANE), lambda i: (0, 0)),
            pl.BlockSpec((1, LANE), lambda i: (0, 0)),
        ],
        # Unpadded output block: last dim == full array dim (3), ~12 B/row writeback.
        out_specs=pl.BlockSpec((tb, out_features), lambda i: (i, 0)),
        compiler_params=pltpu.CompilerParams(
            dimension_semantics=("parallel",),  # shard batch across TCs on v7x
        ),
    )(x, wt_padded, b_padded)


def simple_model_forward(x, weight, bias):
    """Convenience one-shot API. Prefer prepare_params() once + the prepared call."""
    wt_padded, b_padded = prepare_params(weight, bias)
    return simple_model_forward_prepared(
        x, wt_padded, b_padded, out_features=weight.shape[0]
    )


def init_params(key, in_features=IN_FEATURES, out_features=OUT_FEATURES):
    # PyTorch default nn.Linear init: U(-1/sqrt(in), 1/sqrt(in)) for weight and bias.
    kw, kb = jax.random.split(key)
    bound = 1.0 / jnp.sqrt(jnp.float32(in_features))
    weight = jax.random.uniform(
        kw, (out_features, in_features), jnp.float32, -bound, bound
    )
    bias = jax.random.uniform(kb, (out_features,), jnp.float32, -bound, bound)
    return weight, bias


if __name__ == "__main__":
    key = jax.random.PRNGKey(0)
    k_x, k_x2, k_x3, k_p = jax.random.split(key, 4)

    weight, bias = init_params(k_p)
    wt_p, b_p = prepare_params(weight, bias)  # hoisted: one-time param prep

    # 1) Small exact batch (single grid step).
    x = jax.random.normal(k_x, (8, IN_FEATURES), jnp.float32)
    y = simple_model_forward_prepared(x, wt_p, b_p)
    jax.block_until_ready(y)
    y_ref = x @ weight.T + bias
    assert y.shape == (8, OUT_FEATURES)
    assert jnp.allclose(y, y_ref, atol=1e-5, rtol=1e-5)

    # 2) Ragged batch (not a multiple of 8): exercises Pallas' masked writeback of
    #    the partial final block (no wrapper pad / slice passes anymore).
    x2 = jax.random.normal(k_x2, (37, IN_FEATURES), jnp.float32)
    y2 = simple_model_forward_prepared(x2, wt_p, b_p)
    jax.block_until_ready(y2)
    y2_ref = x2 @ weight.T + bias
    assert y2.shape == (37, OUT_FEATURES)
    assert jnp.allclose(y2, y2_ref, atol=1e-5, rtol=1e-5)

    # 3) Multi-step grid with ragged last block (small tb forced for the test;
    #    production tb = min(TB_MAX, round_up(B, 8))).
    x3 = jax.random.normal(k_x3, (300, IN_FEATURES), jnp.float32)
    y3 = simple_model_forward_prepared(x3, wt_p, b_p, tb=64)
    jax.block_until_ready(y3)
    y3_ref = x3 @ weight.T + bias
    assert y3.shape == (300, OUT_FEATURES)
    assert jnp.allclose(y3, y3_ref, atol=1e-5, rtol=1e-5)

    # 4) bf16 streaming path: only taken when x already lives in bf16 upstream
    #    (the wrapper never casts x; the tiny weight is cast to match).
    x_bf = x.astype(jnp.bfloat16)
    y_bf = simple_model_forward_prepared(x_bf, wt_p, b_p)
    jax.block_until_ready(y_bf)
    assert y_bf.shape == (8, OUT_FEATURES)
    assert jnp.allclose(y_bf.astype(jnp.float32), y_ref, atol=5e-2, rtol=5e-2)

    # Convenience one-shot API matches the prepared path.
    y_one = simple_model_forward(x, weight, bias)
    jax.block_until_ready(y_one)
    assert jnp.allclose(y_one, y, atol=1e-6, rtol=1e-6)

    print("KERNEL_OK")
</pallas_src>

<mosaic_0001>
module attributes {stable_mosaic.version = 11 : i64} {
  func.func @linear_kernel(%arg0: i32, %arg1: memref<8x10xf32, #tpu.memory_space<vmem>>, %arg2: memref<10x128xf32, #tpu.memory_space<vmem>>, %arg3: memref<1x128xf32, #tpu.memory_space<vmem>>, %arg4: memref<8x3xf32, #tpu.memory_space<vmem>>) attributes {dimension_semantics = [#tpu.dimension_semantics<parallel>], iteration_bounds = array<i64: 1>, scalar_prefetch = 0 : i64, scratch_operands = 0 : i64, tpu.core_type = #tpu.core_type<tc>, window_params = [{transform_indices = @transform_0, window_bounds = array<i64: 8, 10>}, {pipeline_mode = #tpu.pipeline_mode<synchronous>, transform_indices = @transform_1, window_bounds = array<i64: 10, 128>}, {pipeline_mode = #tpu.pipeline_mode<synchronous>, transform_indices = @transform_2, window_bounds = array<i64: 1, 128>}, {transform_indices = @transform_3, window_bounds = array<i64: 8, 3>}]} {
    %c0 = arith.constant 0 : index
    %c0_0 = arith.constant 0 : index
    %0 = vector.load %arg1[%c0, %c0_0] : memref<8x10xf32, #tpu.memory_space<vmem>>, vector<8x10xf32>
    %c0_1 = arith.constant 0 : index
    %c0_2 = arith.constant 0 : index
    %1 = vector.load %arg2[%c0_1, %c0_2] : memref<10x128xf32, #tpu.memory_space<vmem>>, vector<10x128xf32>
    %cst = arith.constant dense<0.000000e+00> : vector<8x128xf32>
    %2 = tpu.matmul %0, %1, %cst {dimension_numbers = #tpu.dot_dimension_numbers<[1], [0], [0], [1], [0, 0, 1, 1], [], []>} : vector<8x10xf32>, vector<10x128xf32>, vector<8x128xf32> -> vector<8x128xf32>
    %c0_3 = arith.constant 0 : index
    %c0_4 = arith.constant 0 : index
    %3 = vector.load %arg3[%c0_3, %c0_4] : memref<1x128xf32, #tpu.memory_space<vmem>>, vector<1x128xf32>
    %4 = vector.broadcast %3 : vector<1x128xf32> to vector<8x128xf32>
    %5 = arith.addf %2, %4 : vector<8x128xf32>
    %6 = vector.extract_strided_slice %5 {offsets = [0, 0], sizes = [8, 3], strides = [1, 1]} : vector<8x128xf32> to vector<8x3xf32>
    %c0_5 = arith.constant 0 : index
    %c0_6 = arith.constant 0 : index
    %7 = vector.load %arg4[%c0_5, %c0_6] : memref<8x3xf32, #tpu.memory_space<vmem>>, vector<8x3xf32>
    tpu.vector_store %arg4[%c0_5, %c0_6], %6 {strides = array<i32>} : memref<8x3xf32, #tpu.memory_space<vmem>>, vector<8x3xf32>,
    return
  }
  func.func @transform_0(%arg0: i32) -> (i32, i32) {
    %c0_i32 = arith.constant 0 : i32
    %c0_i32_0 = arith.constant 0 : i32
    return %arg0, %c0_i32 : i32, i32
  }
  func.func @transform_1(%arg0: i32) -> (i32, i32) {
    %c0_i32 = arith.constant 0 : i32
    %c0_i32_0 = arith.constant 0 : i32
    %c0_i32_1 = arith.constant 0 : i32
    return %c0_i32, %c0_i32_0 : i32, i32
  }
  func.func @transform_2(%arg0: i32) -> (i32, i32) {
    %c0_i32 = arith.constant 0 : i32
    %c0_i32_0 = arith.constant 0 : i32
    %c0_i32_1 = arith.constant 0 : i32
    return %c0_i32, %c0_i32_0 : i32, i32
  }
  func.func @transform_3(%arg0: i32) -> (i32, i32) {
    %c0_i32 = arith.constant 0 : i32
    %c0_i32_0 = arith.constant 0 : i32
    return %arg0, %c0_i32 : i32, i32
  }
}

</mosaic_0001>

<bundles_post_ra>
// kernel: simple_model_forward_prepared.1
= control target key start
LH: loop header
LB: loop body
LE: loop exit
PB: predicated region body
PF: predicated region fallthrough
CT: control target
= control target key end

     0   :  { %8 = vsyncpa [#allocation3], 0  ;;  %s274_s0 = inlined_call_operand.hbm [shape: f32[8,10], index: 0, kind: input, shape index: {}]   ;;  %s275_s1 = inlined_call_operand.hbm [shape: f32[10,128], index: 1, kind: input, shape index: {}]   ;;  %s276_s2 = inlined_call_operand.vmem [shape: f32[1,128], index: 2, kind: input, shape index: {}]   ;;  %s277_s3 = inlined_call_operand.vmem [shape: f32[8,3], index: 3, kind: output, shape index: {}]  }
   0x1   :  { %9 = vsyncpa [#allocation5], 0  ;;  %s209_s12 = smov [#allocation2]   ;;  %s210_s14 = smov [#allocation4]  }
   0x2   :  { %s16_s13 = sshll.u32 %s209_s12, 4  ;;  %s25_s15 = sshll.u32 %s210_s14, 4  ;;  %s17_s13 = int_to_ptr.vmem [resolvable:$true] %s16_s13  ;;  %s237_s15 = int_to_ptr.vmem [resolvable:$true] %s25_s15 }
   0x3   :  { %s161_s18 = scalar_lea.hbm %s274_s0, 128 }
   0x4   :  { %p162_p0 = scmp.ne.s32.totalorder %s274_s0, %s161_s18  ;;  %p165_p1 = scmp.lt.u32.totalorder %s161_s18, %s274_s0 }
   0x6   :  { %p167_p2 = pnand %p165_p1, %p162_p0 }
   0x8   :  { %170 = shalt.err (!%p167_p2)
}
   0x9   :  { %s171_s23 = scalar_lea.vmem %s17_s13, 128  ;;  %p176_p4 = scmp.lt.s32.totalorder %s17_s13, %s17_s13 }
   0xa   :  { %p172_p3 = scmp.ne.s32.totalorder %s17_s13, %s171_s23  ;;  %p177_p5 = scmp.lt.s32.totalorder %s171_s23, %s171_s23 }
   0xc   :  { %p178_p6 = por %p177_p5, %p176_p4 }
   0xe   :  { %p179_p7 = pnand %p178_p6, %p172_p3 }
  0x10   :  { %182 = shalt.err (!%p179_p7)
}
  0x11   :  { %19 = dma.hbm_to_vmem [thread:$0]  %s274_s0, 128, %s17_s13, [#allocation3]  }
  0x12   :  { %s183_s28 = scalar_lea.hbm %s275_s1, 256 }
  0x13   :  { %p184_p8 = scmp.ne.s32.totalorder %s275_s1, %s183_s28  ;;  %p187_p9 = scmp.lt.u32.totalorder %s183_s28, %s275_s1 }
  0x15   :  { %p189_p10 = pnand %p187_p9, %p184_p8 }
  0x17   :  { %192 = shalt.err (!%p189_p10)
}
  0x18   :  { %s193_s6 = scalar_lea.vmem %s237_s15, 256  ;;  %p198_p12 = scmp.lt.s32.totalorder %s237_s15, %s237_s15 }
  0x19   :  { %p194_p11 = scmp.ne.s32.totalorder %s237_s15, %s193_s6  ;;  %p199_p13 = scmp.lt.s32.totalorder %s193_s6, %s193_s6 }
  0x1b   :  { %p200_p0 = por %p199_p13, %p198_p12 }
  0x1d   :  { %p201_p1 = pnand %p200_p0, %p194_p11 }
  0x1f   :  { %204 = shalt.err (!%p201_p1)
}
  0x20   :  { %s211_s0 = smov 128   ;;  %s212_s7 = smov 8  }
  0x21   :  { %31 = dma.hbm_to_vmem [thread:$0]  %s275_s1, 256, %s237_s15, [#allocation5], %s211_s0, %s211_s0, %s212_s7  }
  0x22   :  { %205 = dma.done.wait [#allocation3], 128  }
  0x23   :  { %206 = vsyncadd [#allocation3], 4294967168 }
  0x24   :  { %207 = dma.done.wait [#allocation5], 256  }
  0x25   :  { %208 = vsyncadd [#allocation5], 4294967040  ;;  %v213_v0 = vmov 0.0|0.0   ;;  %vm214_vm0 = vmmov 0   ;;  %v215_v1 = vmov 0.0   ;;  %vm54_vm1 = vcmask 1041408  }
  0x26   :  { %149 = vmatprep.subr.bf16.mxu0 %v213_v0  ;;  %146 = vmatprep.mubr.msk.f32.mxu0 %vm214_vm0, %v215_v1  ;;  %v41_v2 = vld [vmem:[#allocation4] sm:$0xff]  ;;  %v42_v3 = vld [vmem:[#allocation4 + $0x8] sm:$0x3]  ;;  %vm216_vm2 = vmmov 1   ;;  %v40_v5 = vld [vmem:[#allocation2] sm:$0xff]  ;;  %vm50_vm4 = vcmask 80896  }
  0x27   :  { %vm151_vm3 = vmpackc.low %vm54_vm1, %vm216_vm2  ;;  %v150_v4 = vpack.c.bf16 %v42_v3, %v41_v2  ;;  %v136_v6 = vld [vmem:[%s276_s2] ss:$0 sm:$0xff]  ;;  %vm128_vm5 = vcmask 23552  }
  0x29   :  { %152 = vmatpush3.bf16.msk.msra.mxu0 %vm151_vm3, %v150_v4 }
  0x2c   :  { %147 = vmatmul.mubr.msk.f32.vlgmr.msra.gmra.mrb[0].mxu0 %vm50_vm4, %v40_v5 }
  0xff   :  { %v124_v7 = vpop.f32.mrb[0].mxu0 }
 0x100   :  { %v125_v8 = vadd.f32 %v136_v6, %v124_v7  ;;  %v148_v9 = vpop.f32.mrb[1].mxu0 }
 0x102   :  { %129 = vst.msk [vmem:[%s277_s3] sm:$0xff] %vm128_vm5, %v125_v8 }
 0x103   :  { %134 = vsyncpa [#allocation3], 1 }
 0x104   :  { %135 = vsyncpa [#allocation5], 1 }

</bundles_post_ra>
